<compile_context>
chip_gen: v6e
topology: v6e:2x2x1
jax: 0.10.0
libtpu: 0.0.40
codegen_flags: <defaults>
</compile_context>

<pallas_src>
import functools

import numpy as np
import jax
import jax.numpy as jnp
from jax.experimental import pallas as pl
from jax.experimental.pallas import tpu as pltpu


# ---------------------------------------------------------------------------
# Host-side helpers (index rule, budgets, tile sizing)
# ---------------------------------------------------------------------------

def _nearest_src_indices(out_size: int, in_size: int) -> np.ndarray:
    # PyTorch mode='nearest': src = floor(dst * (in_size / out_size)), clamped.
    dst = np.arange(out_size, dtype=np.float64)
    src = np.floor(dst * (in_size / out_size)).astype(np.int32)
    return np.clip(src, 0, in_size - 1)


def _compute_dtype_for(dtype):
    # bf16 stays bf16 on the MXU (one-hot selection is exact in any dtype);
    # everything else goes through f32.  Mosaic lowers f32 matmuls as genuine
    # multi-pass f32 on the MXU, so gathered f32 values round-trip exactly
    # (asserted to 1e-6 by the self-test below); f32 data is never downcast.
    return jnp.bfloat16 if jnp.dtype(dtype) == jnp.dtype(jnp.bfloat16) else jnp.float32


def _ceil_to(x: int, m: int) -> int:
    return -(-int(x) // int(m)) * int(m)


def _sublane_mult(itemsize: int) -> int:
    # Rows packed per vreg tile: 8 for 4-byte dtypes, 16 for 2-byte.
    return max(8, 32 // max(int(itemsize), 1))


def _vmem_budgets():
    """(scoped VMEM limit, per-step working-set budget, prefer-even-steps)."""
    try:
        vmem = int(pltpu.get_tpu_info().vmem_capacity_bytes)
    except Exception:
        vmem = 64 * 1024 * 1024                      # conservative: v7x-class
    if vmem >= 100 * 1024 * 1024:                    # v5e / v6e: 128 MiB VMEM
        return 96 * 1024 * 1024, 32 * 1024 * 1024, False
    # v7x-class: 64 MiB physical VMEM, 2 TensorCores share the chip -> keep
    # tighter budgets and prefer an even grid-step count so the 'parallel'
    # axis splits evenly across both cores.
    return 48 * 1024 * 1024, 12 * 1024 * 1024, True


def _pick_block_nc(nc, bytes_per_image, fixed_bytes, align, budget, prefer_even):
    """Block size along the flattened N*C axis; grid = ceil(nc / tb).

    Largest sublane-aligned block fitting the per-step VMEM budget, with a
    best-effort preference for >= 2 grid steps (DMA/compute overlap, megacore
    sharding) and an even step count on 2-TensorCore parts.  Ragged last
    blocks are handled by Pallas's built-in read padding / write masking.
    """
    avail = max(budget - fixed_bytes, bytes_per_image)
    cap = max(1, avail // max(bytes_per_image, 1))

    def tb_for(steps):
        tb = -(-nc // steps)
        if tb < nc:
            tb = min(nc, _ceil_to(tb, align))
        return tb

    def steps_for(tb):
        return -(-nc // tb)

    if cap >= nc:
        steps = 1
    else:
        steps = steps_for(min(nc, max(align, (cap // align) * align)))
    if steps == 1 and nc >= 2 * align:
        steps = 2                      # enable pipeline overlap / 2-TC split
    if prefer_even and steps > 1 and steps % 2 == 1:
        steps += 1                     # v7x: keep both TensorCores busy
    tb = tb_for(steps)
    return tb, steps_for(tb)


# ---------------------------------------------------------------------------
# Kernels
# ---------------------------------------------------------------------------

def _resize_kron_kernel(x_ref, s_ref, o_ref):
    # x_ref: (tb, H_in*W_in), s_ref: (H_in*W_in, H_out*W_out) one-hot kron,
    # o_ref: (tb, H_out*W_out).  One wide MXU matmul, lane-dense output.
    x = x_ref[...].astype(s_ref.dtype)
    out = jnp.dot(x, s_ref[...], preferred_element_type=jnp.float32)
    o_ref[...] = out.astype(o_ref.dtype)


def _resize_wgather_kernel(x_ref, sw_ref, o_ref, *, src_h, w_out):
    # x_ref : (tb, H_in, W_in) image block
    # sw_ref: (W_in, W_out)    one-hot column-selection matrix (constant)
    # o_ref : (tb, H_out*W_out) lane-dense flat output block
    tb, h_in, w_in = x_ref.shape
    x = x_ref[...].astype(sw_ref.dtype)

    # W gather as ONE wide 2-D MXU matmul (exact: sw is one-hot).
    xw = jnp.dot(x.reshape(tb * h_in, w_in), sw_ref[...],
                 preferred_element_type=jnp.float32)
    xw = xw.reshape(tb, h_in, w_out).astype(o_ref.dtype)

    # H gather = pure copies with compile-time-constant row indices, fused
    # with the stores into the flat (lane-dense) output block.  Zero MXU work,
    # no dot_general transpose relayout, no narrow masked output blocks.
    for o, h in enumerate(src_h):
        o_ref[:, o * w_out:(o + 1) * w_out] = xw[:, int(h), :]


# ---------------------------------------------------------------------------
# Wrapper
# ---------------------------------------------------------------------------

def interpolate_nearest(x: jnp.ndarray, size) -> jnp.ndarray:
    """Nearest-neighbour resize of an NCHW tensor to `size` = (H_out, W_out)."""
    n, c, h_in, w_in = x.shape
    if isinstance(size, (int, np.integer)):
        h_out = w_out = int(size)
    else:
        h_out, w_out = int(size[0]), int(size[1])
    nc = n * c

    if (h_out, w_out) == (h_in, w_in):
        return x

    cdt = _compute_dtype_for(x.dtype)
    isz = jnp.dtype(x.dtype).itemsize
    csz = jnp.dtype(cdt).itemsize
    in_px, out_px = h_in * w_in, h_out * w_out
    align = 16 if isz <= 2 else 8                 # sublane packing of the dtype

    src_h = _nearest_src_indices(h_out, h_in)
    src_w = _nearest_src_indices(w_out, w_in)

    vmem_limit, work_budget, prefer_even = _vmem_budgets()
    compiler_params = pltpu.CompilerParams(
        dimension_semantics=("parallel",),
        vmem_limit_bytes=vmem_limit,
    )

    # Fused single-matmul path threshold: larger for bf16 on 128-MiB parts
    # (v6e MXU headroom absorbs the FLOP blow-up), tight for f32 / 64-MiB parts.
    kron_max_bytes = 2 * 1024 * 1024
    if csz == 2 and work_budget >= 32 * 1024 * 1024:
        kron_max_bytes = 6 * 1024 * 1024

    # ---- Small-spatial path: single fused selection matmul ------------------
    if in_px * out_px * csz <= kron_max_bytes:
        sh = np.zeros((h_out, h_in), dtype=np.float32)
        sh[np.arange(h_out), src_h] = 1.0
        sw = np.zeros((w_out, w_in), dtype=np.float32)
        sw[np.arange(w_out), src_w] = 1.0
        sel = jnp.asarray(np.kron(sh.T, sw.T), dtype=cdt)  # (H_in*W_in, H_out*W_out)

        in_px_p = _ceil_to(in_px, 128)
        out_px_p = _ceil_to(out_px, 128)
        bytes_per_image = (2 * in_px_p * isz + 2 * out_px_p * isz
                           + in_px_p * csz + out_px_p * (4 + isz))
        fixed = 2 * _ceil_to(in_px, _sublane_mult(csz)) * out_px_p * csz
        tb, steps = _pick_block_nc(nc, bytes_per_image, fixed, align,
                                   work_budget, prefer_even)

        x_flat = x.reshape(nc, in_px)
        out_flat = pl.pallas_call(
            _resize_kron_kernel,
            out_shape=jax.ShapeDtypeStruct((nc, out_px), x.dtype),
            grid_spec=pltpu.PrefetchScalarGridSpec(
                num_scalar_prefetch=0,
                grid=(steps,),
                in_specs=[
                    pl.BlockSpec((tb, in_px), lambda i: (i, 0)),
                    pl.BlockSpec((in_px, out_px), lambda i: (0, 0)),
                ],
                out_specs=pl.BlockSpec((tb, out_px), lambda i: (i, 0)),
            ),
            compiler_params=compiler_params,
        )(x_flat, sel)
        return out_flat.reshape(n, c, h_out, w_out)

    # ---- General path: wide W-gather matmul + zero-FLOP H row copies --------
    sw_np = np.zeros((w_in, w_out), dtype=np.float32)
    sw_np[src_w, np.arange(w_out)] = 1.0
    sw_t = jnp.asarray(sw_np, dtype=cdt)               # (W_in, W_out)

    w_in_p = _ceil_to(w_in, 128)
    w_out_p = _ceil_to(w_out, 128)
    out_flat_p = _ceil_to(out_px, 128)
    # Padding-aware working set per image (double-buffered blocks + the cast
    # copy, f32 matmul result and its cast), so tb never overshoots VMEM.
    bytes_per_image = (
        2 * _ceil_to(h_in, _sublane_mult(isz)) * w_in_p * isz   # input block x2
        + 2 * out_flat_p * isz                                   # flat output block x2
        + _ceil_to(h_in, _sublane_mult(csz)) * w_in_p * csz      # cast input copy
        + h_in * w_out_p * 4                                     # f32 matmul result
        + _ceil_to(h_in, _sublane_mult(isz)) * w_out_p * isz     # result cast copy
    )
    fixed = 2 * _ceil_to(w_in, _sublane_mult(csz)) * w_out_p * csz
    tb, steps = _pick_block_nc(nc, bytes_per_image, fixed, align,
                               work_budget, prefer_even)

    kernel = functools.partial(_resize_wgather_kernel, src_h=src_h, w_out=w_out)
    x3 = x.reshape(nc, h_in, w_in)
    out_flat = pl.pallas_call(
        kernel,
        out_shape=jax.ShapeDtypeStruct((nc, out_px), x.dtype),
        grid_spec=pltpu.PrefetchScalarGridSpec(
            num_scalar_prefetch=0,
            grid=(steps,),
            in_specs=[
                pl.BlockSpec((tb, h_in, w_in), lambda i: (i, 0, 0)),
                pl.BlockSpec((w_in, w_out), lambda i: (0, 0)),
            ],
            out_specs=pl.BlockSpec((tb, out_px), lambda i: (i, 0)),
        ),
        compiler_params=compiler_params,
    )(x3, sw_t)

    return out_flat.reshape(n, c, h_out, w_out)


class Interpolate:
    """JAX/Pallas counterpart of the PyTorch Interpolate module."""

    def __init__(self, size, mode="nearest", align_corners=False):
        assert mode == "nearest", "only mode='nearest' implemented"
        self.size = size
        self.mode = mode
        self.align_corners = align_corners  # ignored for nearest (PyTorch rule)

    def __call__(self, x):
        return interpolate_nearest(x, self.size)


if __name__ == "__main__":
    key = jax.random.PRNGKey(0)

    def ref_nearest(xn, h_out, w_out):
        h_in, w_in = xn.shape[2:]
        hi = np.floor(np.arange(h_out) * (h_in / h_out)).astype(np.int64)
        wi = np.floor(np.arange(w_out) * (w_in / w_out)).astype(np.int64)
        return xn[:, :, hi][:, :, :, wi]

    cases = [
        ((2, 8, 8, 8),   (16, 16), jnp.float32),   # kron path, 2x upsample, 2 steps
        ((4, 5, 16, 16), (32, 32), jnp.float32),   # kron path, ragged last block (nc=20)
        ((2, 8, 8, 8),   (16, 16), jnp.bfloat16),  # kron path, bf16 MXU operands
        ((2, 4, 32, 32), (48, 80), jnp.float32),   # general path, wide lane-dense output
        ((2, 4, 32, 32), (48, 16), jnp.float32),   # general path, narrow W_out
        ((2, 4, 32, 32), (48, 80), jnp.bfloat16),  # general path, bf16
    ]
    for shape, size, dtype in cases:
        key, sub = jax.random.split(key)
        x = jax.random.normal(sub, shape, dtype=jnp.float32).astype(dtype)

        module = Interpolate(size=size, mode="nearest", align_corners=False)
        out = jax.block_until_ready(module(x))

        assert out.shape == shape[:2] + tuple(size)
        assert out.dtype == x.dtype
        ref = ref_nearest(np.asarray(x, dtype=np.float32), *size)
        tol = 1e-6 if dtype == jnp.float32 else 1e-2
        np.testing.assert_allclose(np.asarray(out, dtype=np.float32), ref,
                                   rtol=tol, atol=tol)
    print("KERNEL_OK")
</pallas_src>

<mosaic_0001>
module attributes {stable_mosaic.version = 11 : i64} {
  func.func @_resize_kron_kernel(%arg0: i32, %arg1: memref<8x64xf32, #tpu.memory_space<vmem>>, %arg2: memref<64x256xf32, #tpu.memory_space<vmem>>, %arg3: memref<8x256xf32, #tpu.memory_space<vmem>>) attributes {dimension_semantics = [#tpu.dimension_semantics<parallel>], iteration_bounds = array<i64: 2>, scalar_prefetch = 0 : i64, scratch_operands = 0 : i64, tpu.core_type = #tpu.core_type<tc>, window_params = [{transform_indices = @transform_0, window_bounds = array<i64: 8, 64>}, {pipeline_mode = #tpu.pipeline_mode<synchronous>, transform_indices = @transform_1, window_bounds = array<i64: 64, 256>}, {transform_indices = @transform_2, window_bounds = array<i64: 8, 256>}]} {
    %c0 = arith.constant 0 : index
    %c0_0 = arith.constant 0 : index
    %0 = vector.load %arg1[%c0, %c0_0] : memref<8x64xf32, #tpu.memory_space<vmem>>, vector<8x64xf32>
    %c0_1 = arith.constant 0 : index
    %c0_2 = arith.constant 0 : index
    %1 = vector.load %arg2[%c0_1, %c0_2] : memref<64x256xf32, #tpu.memory_space<vmem>>, vector<64x256xf32>
    %cst = arith.constant dense<0.000000e+00> : vector<8x256xf32>
    %2 = tpu.matmul %0, %1, %cst {dimension_numbers = #tpu.dot_dimension_numbers<[1], [0], [0], [1], [0, 0, 1, 1], [], []>} : vector<8x64xf32>, vector<64x256xf32>, vector<8x256xf32> -> vector<8x256xf32>
    %c0_3 = arith.constant 0 : index
    %c0_4 = arith.constant 0 : index
    %3 = vector.load %arg3[%c0_3, %c0_4] : memref<8x256xf32, #tpu.memory_space<vmem>>, vector<8x256xf32>
    tpu.vector_store %arg3[%c0_3, %c0_4], %2 {strides = array<i32>} : memref<8x256xf32, #tpu.memory_space<vmem>>, vector<8x256xf32>,
    return
  }
  func.func @transform_0(%arg0: i32) -> (i32, i32) {
    %c0_i32 = arith.constant 0 : i32
    %c0_i32_0 = arith.constant 0 : i32
    return %arg0, %c0_i32 : i32, i32
  }
  func.func @transform_1(%arg0: i32) -> (i32, i32) {
    %c0_i32 = arith.constant 0 : i32
    %c0_i32_0 = arith.constant 0 : i32
    %c0_i32_1 = arith.constant 0 : i32
    return %c0_i32, %c0_i32_0 : i32, i32
  }
  func.func @transform_2(%arg0: i32) -> (i32, i32) {
    %c0_i32 = arith.constant 0 : i32
    %c0_i32_0 = arith.constant 0 : i32
    return %arg0, %c0_i32 : i32, i32
  }
}

</mosaic_0001>

<bundles_post_ra>
// kernel: tpu_custom_call.1
= control target key start
LH: loop header
LB: loop body
LE: loop exit
PB: predicated region body
PF: predicated region fallthrough
CT: control target
= control target key end

     0   :  { %7 = vsyncpa [#allocation3], 0  ;;  %s749_s0 = inlined_call_operand.hbm [shape: f32[16,64], index: 0, kind: input, shape index: {}]   ;;  %s750_s1 = inlined_call_operand.hbm [shape: f32[64,256], index: 1, kind: input, shape index: {}]   ;;  %s751_s2 = inlined_call_operand.hbm [shape: f32[16,256], index: 2, kind: output, shape index: {}]  }
   0x1   :  { %9 = vsyncpa [#allocation3 + $0x1], 0 }
   0x2   :  { %10 = vsyncpa [#allocation6], 0 }
   0x3   :  { %11 = vsyncpa [#allocation4], 0 }
   0x4   :  { %13 = vsyncpa [#allocation4 + $0x1], 0  ;;  %s585_s9 = smov 0   ;;  %s587_s10 = smov 0  }
   0x5   :  { %s589_s11 = smov 0   ;;  %s591_s12 = smov 0  }
   0x6 LB: > { %s606_s13 = sadd.s32 4294967295, %s562_s12   ;;  %s363_s14 = sadd.s32 4294967294, %s562_s12   ;;  %s562_s12 = sphi %s591_s12, %s773_s12   ;;  %s558_s11 = sphi %s589_s11, %s772_s11   ;;  %s554_s10 = sphi %s587_s10, %s771_s10   ;;  %s550_s9 = sphi %s585_s9, %s770_s9  }
   0x7   : > { %p39_p0 = scmp.ne.s32.totalorder %s554_s10, %s550_s9  ;;  %p752_p1 = scmp.eq.s32.totalorder %s606_s13, 0 }
   0x8   : > { %p90_p3 = scmp.eq.s32.totalorder %s363_s14, 1  ;;  %p364_p5 = scmp.ge.s32.totalorder %s562_s12, 1 }
   0x9   : > { %p615_p4 = por %p752_p1, %p39_p0  ;;  %p97_p7 = scmp.lt.s32.totalorder %s562_s12, 3 }
   0xa   : > { %p620_p6 = por %p90_p3, %p39_p0  ;;  %s564_s18 = smov [#allocation5]  }
   0xb   : > { %s756_s15 = scalar_select %p615_p4, 1, 0 }
   0xc   : > { %s757_s16 = scalar_select %p620_p6, 1, 0 }
   0xd   : > { %p625_p8 = pnand %p364_p5, %p97_p7  ;;  %s109_s19 = sshll.u32 %s564_s18, 4  ;;  %s110_s19 = int_to_ptr.vmem [resolvable:$true] %s109_s19 }
   0xe   : > { %s639_s21 = sadd.s32 1, %s562_s12   ;;  %s26_s22 = sadd.s32 1, %s558_s11 }
   0xf   : > { %s758_s17 = scalar_select %p625_p8, 1, 0 }
  0x10   : > { %p388_p9 = pneg %p625_p8  ;;  %s23_s23 = ssub.s32 %s562_s12, %s639_s21 }
  0x11   : > { %s451_s24 = scalar_lea.vmem %s110_s19, 2048  ;;  %p459_p5 = scmp.lt.s32.totalorder %s110_s19, %s110_s19 }
  0x12   : > { %p634_p11 = pnand %p388_p9, %p752_p1  ;;  %p452_p13 = scmp.ne.s32.totalorder %s110_s19, %s451_s24 }
  0x13   : > { %p460_p7 = scmp.lt.s32.totalorder %s451_s24, %s451_s24 }
  0x14   : > { %p442_p12 = pneg %p634_p11 }
  0x15   : > { %p461_p10 = por %p460_p7, %p459_p5 }
  0x16   : > { %p454_p0 = pnand %p452_p13, %p442_p12 }
  0x18   : > { %p455_p3 = pneg %p454_p0 }
  0x1a   : > { %p462_p2 = pnand %p461_p10, %p455_p3 }
  0x1c   : > { %465 = shalt.err (!%p462_p2)
}
  0x1d   : > { %s565_s25 = smov 256   ;;  %s566_s26 = smov 16  }
  0x1e   : > { %391 = dma.hbm_to_vmem [thread:$0]  (!%p634_p11), %s750_s1, 2048, %s110_s19, [#allocation6], %s565_s25, %s565_s25, %s566_s26  }
  0x1f   : > { %p24_p9 = scmp.eq.s32.totalorder %s23_s23, 0  ;;  %p33_p12 = scmp.ne.s32.totalorder %s558_s11, %s554_s10 }
  0x20   : > { %p34_p10 = scmp.eq.s32.totalorder %s562_s12, 0  ;;  %p401_p2 = scmp.lt.s32.totalorder %s562_s12, 2 }
  0x21   : > { %s656_s29 = scalar_select %p24_p9, %s558_s11, %s26_s22  }
  0x22   : > { %p35_p13 = por %p34_p10, %p33_p12  ;;  %p760_p0 = scmp.eq.s32.totalorder %s606_s13, 1 }
  0x23   : > { %s123_s3 = sand.u32 1, %s558_s11   ;;  %s368_s4 = sshll.u32 %s562_s12, 7 }
  0x24   : > { %p660_p3 = por %p760_p0, %p33_p12  ;;  %s367_s5 = sshll.u32 %s123_s3, 3 }
  0x25   : > { %s669_s8 = scalar_lea.hbm %s749_s0, %s368_s4  ;;  %s127_s14 = scalar_lea.vmem [#allocation2], %s367_s5 }
  0x26   : > { %s761_s30 = scalar_select %p660_p3, 1, 0 }
  0x27   : > { %s134_s18 = sshll.u32 %s127_s14, 4  ;;  %p671_p11 = pnand %p401_p2, %p35_p13  ;;  %s135_s18 = int_to_ptr.vmem [resolvable:$true] %s134_s18 }
  0x28   : > { %s124_s20 = scalar_lea.sflag [#allocation3], %s123_s3  ;;  %s466_s22 = scalar_lea.hbm %s669_s8, 128 }
  0x29   : > { %p467_p5 = scmp.ne.s32.totalorder %s669_s8, %s466_s22  ;;  %p468_p7 = pneg %p671_p11 }
  0x2a   : > { %s471_s25 = scalar_lea.hbm %s749_s0, 256  ;;  %p472_p10 = scmp.lt.s32.totalorder %s669_s8, %s749_s0 }
  0x2b   : > { %p469_p9 = pnand %p468_p7, %p467_p5  ;;  %p473_p2 = scmp.lt.s32.totalorder %s471_s25, %s466_s22 }
  0x2d   : > { %p470_p12 = pneg %p469_p9  ;;  %p474_p13 = por %p473_p2, %p472_p10 }
  0x2f   : > { %p475_p0 = pnand %p474_p13, %p470_p12 }
  0x31   : > { %478 = shalt.err (!%p475_p0)
}
  0x32   : > { %s479_s28 = scalar_lea.vmem %s135_s18, 128  ;;  %s567_s3 = smov [#allocation2]  }
  0x33   : > { %p480_p1 = scmp.ne.s32.totalorder %s135_s18, %s479_s28  ;;  %s484_s4 = sshll.u32 %s567_s3, 4  ;;  %s485_s4 = int_to_ptr.vmem [resolvable:$false] %s484_s4 }
  0x34   : > { %s486_s5 = scalar_lea.vmem %s485_s4, 256  ;;  %p487_p5 = scmp.lt.s32.totalorder %s135_s18, %s485_s4 }
  0x35   : > { %p482_p6 = pnand %p480_p1, %p468_p7  ;;  %p488_p9 = scmp.lt.s32.totalorder %s486_s5, %s479_s28 }
  0x37   : > { %p483_p3 = pneg %p482_p6  ;;  %p489_p4 = por %p488_p9, %p487_p5 }
  0x39   : > { %p490_p8 = pnand %p489_p4, %p483_p3 }
  0x3b   : > { %493 = shalt.err (!%p490_p8)
}
  0x3c   : > { %395 = dma.hbm_to_vmem [thread:$0]  (!%p671_p11), %s669_s8, 128, %s135_s18, %s124_s20  }
  0x3d   : > { %p763_p12 = scmp.ne.s32.totalorder %s758_s17, 0 }
  0x3e   : > { %s692_s6 = sand.u32 (!%p763_p12), 1, %s554_s10   ;;  %p764_p1 = scmp.ne.s32.totalorder (!%p763_p12), %s756_s15, 0 }
  0x3f   : > { %143 = sbr.rel (%p763_p12) target bundleno = 297 (0x129), region = 28  ;;  %s370_s7 = sshll.u32 (!%p763_p12), %s692_s6, 3 }
  0x40   : > { %s146_s14 = scalar_lea.sflag (!%p763_p12), [#allocation3], %s692_s6  ;;  %s696_s22 = scalar_lea.vmem (!%p763_p12), [#allocation2], %s370_s7 }
  0x44   : > { %537 = dma.done.wait (%p764_p1), %s146_s14, 128  }
  0x45   : > { %539 = vsyncadd (%p764_p1), %s146_s14, 4294967168  ;;  %p765_p4 = scmp.eq.s32.totalorder %s606_s13, 0 }
  0x47   : > { %541 = dma.done.wait (%p765_p4), [#allocation6], 2048   ;;  %p766_p6 = pmov %p765_p4 }
  0x48   : > { %v568_v0 = vmov 0.0   ;;  %v190_v1 = vld [vmem:[#allocation5 + $0x78] sm:$0xff]  ;;  %v189_v2 = vld [vmem:[#allocation5 + $0x70] sm:$0xff]  ;;  %v188_v3 = vld [vmem:[#allocation5 + $0x68] sm:$0xff]  ;;  %vm191_vm0 = vcmask 523264   ;;  %s372_s15 = sshll.u32 %s692_s6, 4 }
  0x49   : > { %543 = vsyncadd (%p766_p6), [#allocation6], 4294965248  ;;  %259 = vmatprep.mubr.f32.mxu0 %v568_v0  ;;  %211 = vmatprep.subr.mxu0 %v190_v1  ;;  %v187_v4 = vld [vmem:[#allocation5 + $0x60] sm:$0xff]  ;;  %v186_v5 = vld [vmem:[#allocation5 + $0x58] sm:$0xff]  ;;  %s173_s17 = scalar_lea.vmem [#allocation7], %s372_s15  ;;  %s379_s18 = sshll.u32 %s606_s13, 8 }
  0x4a   : > { %212 = vmatpush1.msra.mxu0 %v189_v2  ;;  %v185_v6 = vld [vmem:[#allocation5 + $0x50] sm:$0xff]  ;;  %v184_v7 = vld [vmem:[#allocation5 + $0x48] sm:$0xff]  ;;  %v183_v8 = vld [vmem:[#allocation5 + $0x40] sm:$0xff]  ;;  %s283_s8 = sshll.u32 %s173_s17, 4  ;;  %s281_s23 = scalar_lea.hbm %s751_s2, %s379_s18  ;;  %s709_s8 = int_to_ptr.vmem [resolvable:$true] %s283_s8 }
  0x4b   : > { %213 = vmatprep.subr.mxu0 %v188_v3  ;;  %v182_v9 = vld [vmem:[#allocation5 + $0x38] sm:$0xff]  ;;  %v181_v10 = vld [vmem:[#allocation5 + $0x30] sm:$0xff]  ;;  %v180_v11 = vld [vmem:[#allocation5 + $0x28] sm:$0xff]  ;;  %s269_s24 = scalar_lea.sflag [#allocation4], %s692_s6  ;;  %s494_s25 = scalar_lea.vmem %s709_s8, 256 }
  0x4c   : > { %214 = vmatpush1.msra.mxu0 %v187_v4  ;;  %v179_v12 = vld [vmem:[#allocation5 + $0x20] sm:$0xff]  ;;  %v178_v13 = vld [vmem:[#allocation5 + $0x18] sm:$0xff]  ;;  %v177_v14 = vld [vmem:[#allocation5 + $0x10] sm:$0xff]  ;;  %p495_p8 = scmp.ne.s32.totalorder %s709_s8, %s494_s25  ;;  %p767_p3 = scmp.ne.s32.totalorder %s761_s30, 0 }
  0x4d   : > { %215 = vmatprep.subr.mxu0 %v186_v5  ;;  %v176_v15 = vld [vmem:[#allocation5 + $0x8] sm:$0xff]  ;;  %v175_v16 = vld [vmem:[#allocation5] sm:$0xff]  ;;  %v174_v17 = vld [vmem:[%s696_s22] sm:$0xff]  ;;  %s569_s13 = smov [#allocation7]  }
  0x4e   : > { %216 = vmatpush1.msra.mxu0 %v185_v6  ;;  %p496_p11 = pnand %p495_p8, %p767_p3  ;;  %s498_s26 = sshll.u32 %s569_s13, 4  ;;  %s499_s26 = int_to_ptr.vmem [resolvable:$false] %s498_s26 }
  0x4f   : > { %217 = vmatprep.subr.mxu0 %v184_v7  ;;  %s500_s27 = scalar_lea.vmem %s499_s26, 512  ;;  %p501_p10 = scmp.lt.s32.totalorder %s709_s8, %s499_s26 }
  0x50   : > { %218 = vmatpush1.msra.mxu0 %v183_v8  ;;  %p497_p7 = pneg %p496_p11  ;;  %p502_p2 = scmp.lt.s32.totalorder %s500_s27, %s494_s25 }
  0x51   : > { %219 = vmatprep.subr.mxu0 %v182_v9 }
  0x52   : > { %220 = vmatpush1.msra.mxu0 %v181_v10  ;;  %p503_p13 = por %p502_p2, %p501_p10 }
  0x53   : > { %221 = vmatprep.subr.mxu0 %v180_v11 }
  0x54   : > { %222 = vmatpush1.msra.mxu0 %v179_v12  ;;  %p504_p0 = pnand %p503_p13, %p497_p7 }
  0x55   : > { %223 = vmatprep.subr.mxu0 %v178_v13 }
  0x56   : > { %224 = vmatpush1.msra.mxu0 %v177_v14 }
  0x57   : > { %225 = vmatprep.subr.mxu0 %v176_v15 }
  0x58   : > { %226 = vmatpush1.msra.mxu0 %v175_v16 }
  0x59   : > { %373 = vmatmul.mubr.msk.f32.vlgmr.msra.gmra.mxu0 %vm191_vm0, %v174_v17 }
 0x119   : > { %v261_v18 = vpop.f32.mrf.mxu0 }
 0x11a   : > { %266 = vst [vmem:[%s173_s17] sm:$0xff] %v261_v18 }
 0x11b   : > { %v263_v19 = vpop.f32.mrf.mxu0 }
 0x11c   : > { %267 = vst [vmem:[%s173_s17 + $0x8] sm:$0xff] %v263_v19 }
 0x11d   : > { %507 = shalt.err (!%p504_p0)
}
 0x11e   : > { %s508_s28 = scalar_lea.hbm %s281_s23, 256  ;;  %s512_s5 = scalar_lea.hbm %s751_s2, 512 }
 0x11f   : > { %p509_p5 = scmp.ne.s32.totalorder %s281_s23, %s508_s28  ;;  %p513_p1 = scmp.lt.s32.totalorder %s281_s23, %s751_s2 }
 0x120   : > { %p514_p4 = scmp.lt.s32.totalorder %s512_s5, %s508_s28 }
 0x121   : > { %p510_p9 = pnand %p509_p5, %p767_p3 }
 0x122   : > { %p515_p6 = por %p514_p4, %p513_p1 }
 0x123   : > { %p511_p12 = pneg %p510_p9 }
 0x125   : > { %p516_p8 = pnand %p515_p6, %p511_p12 }
 0x127   : > { %519 = shalt.err (!%p516_p8)
}
 0x128   : > { %386 = dma.vmem_to_hbm [thread:$0]  (%p767_p3), %s709_s8, 256, %s281_s23, %s269_s24  }
 0x129 PF: > { %s295_s14 = sand.u32 1, %s550_s9   ;;  %p768_p11 = scmp.ne.s32.totalorder %s757_s16, 0 }
 0x12a   : > { %p769_p7 = scmp.ge.s32.totalorder %s562_s12, 2  ;;  %s296_s22 = scalar_lea.sflag [#allocation4], %s295_s14 }
 0x12c   : > { %p397_p10 = pnand %p769_p7, %p768_p11 }
 0x12e   : > { %p398_p2 = pneg %p397_p10 }
 0x130   : > { %545 = dma.done.wait (%p398_p2), %s296_s22, 256  }
 0x131   : > { %547 = vsyncadd (%p398_p2), %s296_s22, 4294967040  ;;  %p16_p13 = scmp.ge.s32.totalorder %s639_s21, 4   ;;  %s770_s9 = smov %s554_s10 }
 0x132   : > { %s771_s10 = smov %s558_s11  ;;  %s772_s11 = smov %s656_s29 }
 0x133   : > { %s773_s12 = smov %s639_s21  ;;  %18 = sbr.rel (!%p16_p13) target bundleno = 6 (0x6), region = 77 }
 0x138   :  { %301 = vsyncpa [#allocation3], 1 }
 0x139   :  { %303 = vsyncpa [#allocation3 + $0x1], 1 }
 0x13a   :  { %304 = vsyncpa [#allocation6], 1 }
 0x13b   :  { %305 = vsyncpa [#allocation4], 1 }
 0x13c   :  { %307 = vsyncpa [#allocation4 + $0x1], 1 }

</bundles_post_ra>
